<compile_context>
chip_gen: v7x
topology: tpu7x:2x2x1
jax: 0.10.0
libtpu: 0.0.40
codegen_flags: <defaults>
</compile_context>

<pallas_src>
import jax
import jax.numpy as jnp
from jax import lax
from jax.experimental import pallas as pl
from jax.experimental.pallas import tpu as pltpu

_FAST_PATH_VMEM_CAP = 48 << 20  # leave headroom in v7x's 64 MiB VMEM


def _bpr_tile_kernel(u_ref, i_ref, j_ref, wt_ref, ht_ref, out_ref):
    """One batch tile: gather TB rows from each table and reduce to (2, TB)."""
    n_users = wt_ref.shape[1]
    n_items = ht_ref.shape[1]
    tb = out_ref.shape[1]

    u_idx = u_ref[...]  # (1, TB) int32
    i_idx = i_ref[...]  # (1, TB) int32
    j_idx = j_ref[...]  # (1, TB) int32

    # One-hot gather masks, one column per batch element: (table_rows, TB).
    u_oh = (lax.broadcasted_iota(jnp.int32, (n_users, tb), 0) == u_idx).astype(jnp.float32)
    i_oh = (lax.broadcasted_iota(jnp.int32, (n_items, tb), 0) == i_idx).astype(jnp.float32)
    j_oh = (lax.broadcasted_iota(jnp.int32, (n_items, tb), 0) == j_idx).astype(jnp.float32)

    wt = wt_ref[...]  # (D, U) resident
    ht = ht_ref[...]  # (D, I) resident

    # MXU gathers: (D, table) @ (table, TB) -> (D, TB).  HIGHEST precision so
    # the 1.0 * row selection reproduces the f32 table entries exactly.
    u_e = jnp.dot(wt, u_oh, precision=lax.Precision.HIGHEST,
                  preferred_element_type=jnp.float32)
    i_e = jnp.dot(ht, i_oh, precision=lax.Precision.HIGHEST,
                  preferred_element_type=jnp.float32)
    j_e = jnp.dot(ht, j_oh, precision=lax.Precision.HIGHEST,
                  preferred_element_type=jnp.float32)

    # Row-wise dot products: f32 VPU multiply + sublane reduce -> (1, TB).
    s_ui = jnp.sum(u_e * i_e, axis=0, keepdims=True)
    s_uj = jnp.sum(u_e * j_e, axis=0, keepdims=True)

    # Single lane-dense (2, TB) store per tile (row 0 = x_ui, row 1 = x_uj).
    out_ref[...] = jnp.concatenate([s_ui, s_uj], axis=0)


def bpr_forward(u, i, j, W, H, *, tb=128):
    """u, i, j: int index vectors of shape (B,). Returns (x_ui, x_uj), each (B,) f32."""
    assert tb % 128 == 0, "batch tile must be a multiple of 128 for lane-dense stores"
    B = u.shape[0]
    n_users, D = W.shape
    n_items = H.shape[0]

    # Pad the batch to a multiple of TB so every output store is an unmasked,
    # (8,128)-aligned lane-dense tile; padded entries gather row 0 and are
    # sliced away afterwards.
    b_pad = ((B + tb - 1) // tb) * tb
    n_tiles = b_pad // tb

    def _prep_idx(x):
        x = x.astype(jnp.int32)
        return jnp.pad(x, (0, b_pad - B)).reshape(1, b_pad)

    u2, i2, j2 = _prep_idx(u), _prep_idx(i), _prep_idx(j)

    # Layout plumbing: transpose the tables once in the wrapper so D sits on
    # sublanes and the batch tile lands on the 128-lane axis inside the kernel.
    Wt = W.astype(jnp.float32).T  # (D, U)
    Ht = H.astype(jnp.float32).T  # (D, I)

    # Resident-footprint estimate for the fast path.
    eb = 4
    table_bytes = (Wt.size + Ht.size) * eb * 2              # (pessimistic) double-buffered
    onehot_bytes = (n_users + 2 * n_items) * tb * eb        # in-kernel one-hot temporaries
    emb_bytes = 3 * D * tb * eb                             # gathered (D, TB) temporaries
    io_bytes = 2 * (3 * tb + 2 * tb) * eb                   # double-buffered idx + out blocks
    vmem_need = table_bytes + onehot_bytes + emb_bytes + io_bytes + (4 << 20)
    if vmem_need > _FAST_PATH_VMEM_CAP:
        # TODO(synk): manual-DMA row-gather path for huge embedding tables.
        raise NotImplementedError(
            "Embedding tables too large for the VMEM-resident fast path.")

    out = pl.pallas_call(
        _bpr_tile_kernel,
        out_shape=jax.ShapeDtypeStruct((2, b_pad), jnp.float32),
        grid=(n_tiles,),
        in_specs=[
            pl.BlockSpec((1, tb), lambda t: (0, t)),                # u indices (per tile)
            pl.BlockSpec((1, tb), lambda t: (0, t)),                # i indices (per tile)
            pl.BlockSpec((1, tb), lambda t: (0, t)),                # j indices (per tile)
            pl.BlockSpec((D, n_users), lambda t: (0, 0)),           # W^T resident
            pl.BlockSpec((D, n_items), lambda t: (0, 0)),           # H^T resident (passed once)
        ],
        out_specs=pl.BlockSpec((2, tb), lambda t: (0, t)),          # disjoint per tile
        compiler_params=pltpu.CompilerParams(
            dimension_semantics=("parallel",),
            vmem_limit_bytes=int(min(max(vmem_need, 32 << 20), _FAST_PATH_VMEM_CAP)),
        ),
    )(u2, i2, j2, Wt, Ht)

    return out[0, :B], out[1, :B]


if __name__ == "__main__":
    user_size, item_size, hidden_dim = 64, 64, 32
    batch = 8

    key = jax.random.PRNGKey(0)
    kW, kH, ku, ki, kj = jax.random.split(key, 5)

    # Deterministic parameter init mirroring torch ...uniform_(0, 1).
    W = jax.random.uniform(kW, (user_size, hidden_dim), dtype=jnp.float32)
    H = jax.random.uniform(kH, (item_size, hidden_dim), dtype=jnp.float32)

    u = jax.random.randint(ku, (batch,), 0, user_size, dtype=jnp.int32)
    i = jax.random.randint(ki, (batch,), 0, item_size, dtype=jnp.int32)
    j = jax.random.randint(kj, (batch,), 0, item_size, dtype=jnp.int32)

    x_ui, x_uj = jax.jit(bpr_forward)(u, i, j, W, H)
    jax.block_until_ready((x_ui, x_uj))

    # Pure-JAX reference for correctness.
    ref_ui = jnp.sum(W[u] * H[i], axis=1)
    ref_uj = jnp.sum(W[u] * H[j], axis=1)
    assert jnp.allclose(x_ui, ref_ui, atol=1e-5, rtol=1e-5)
    assert jnp.allclose(x_uj, ref_uj, atol=1e-5, rtol=1e-5)

    print("KERNEL_OK")
</pallas_src>

<mosaic_0001>
module attributes {stable_mosaic.version = 11 : i64} {
  func.func @_bpr_tile_kernel(%arg0: i32, %arg1: memref<1x128xi32, #tpu.memory_space<vmem>>, %arg2: memref<1x128xi32, #tpu.memory_space<vmem>>, %arg3: memref<1x128xi32, #tpu.memory_space<vmem>>, %arg4: memref<32x64xf32, #tpu.memory_space<vmem>>, %arg5: memref<32x64xf32, #tpu.memory_space<vmem>>, %arg6: memref<2x128xf32, #tpu.memory_space<vmem>>) attributes {dimension_semantics = [#tpu.dimension_semantics<parallel>], iteration_bounds = array<i64: 1>, scalar_prefetch = 0 : i64, scratch_operands = 0 : i64, tpu.core_type = #tpu.core_type<tc>, window_params = [{transform_indices = @transform_0, window_bounds = array<i64: 1, 128>}, {transform_indices = @transform_1, window_bounds = array<i64: 1, 128>}, {transform_indices = @transform_2, window_bounds = array<i64: 1, 128>}, {pipeline_mode = #tpu.pipeline_mode<synchronous>, transform_indices = @transform_3, window_bounds = array<i64: 32, 64>}, {pipeline_mode = #tpu.pipeline_mode<synchronous>, transform_indices = @transform_4, window_bounds = array<i64: 32, 64>}, {transform_indices = @transform_5, window_bounds = array<i64: 2, 128>}]} {
    %c0 = arith.constant 0 : index
    %c0_0 = arith.constant 0 : index
    %0 = vector.load %arg1[%c0, %c0_0] : memref<1x128xi32, #tpu.memory_space<vmem>>, vector<1x128xi32>
    %c0_1 = arith.constant 0 : index
    %c0_2 = arith.constant 0 : index
    %1 = vector.load %arg2[%c0_1, %c0_2] : memref<1x128xi32, #tpu.memory_space<vmem>>, vector<1x128xi32>
    %c0_3 = arith.constant 0 : index
    %c0_4 = arith.constant 0 : index
    %2 = vector.load %arg3[%c0_3, %c0_4] : memref<1x128xi32, #tpu.memory_space<vmem>>, vector<1x128xi32>
    %3 = tpu.iota {dimensions = array<i32: 0>} : vector<64x128xi32>
    %4 = vector.broadcast %0 : vector<1x128xi32> to vector<64x128xi32>
    %5 = arith.cmpi eq, %3, %4 : vector<64x128xi32>
    %6 = arith.extui %5 : vector<64x128xi1> to vector<64x128xi32>
    %7 = arith.sitofp %6 : vector<64x128xi32> to vector<64x128xf32>
    %8 = tpu.iota {dimensions = array<i32: 0>} : vector<64x128xi32>
    %9 = vector.broadcast %1 : vector<1x128xi32> to vector<64x128xi32>
    %10 = arith.cmpi eq, %8, %9 : vector<64x128xi32>
    %11 = arith.extui %10 : vector<64x128xi1> to vector<64x128xi32>
    %12 = arith.sitofp %11 : vector<64x128xi32> to vector<64x128xf32>
    %13 = tpu.iota {dimensions = array<i32: 0>} : vector<64x128xi32>
    %14 = vector.broadcast %2 : vector<1x128xi32> to vector<64x128xi32>
    %15 = arith.cmpi eq, %13, %14 : vector<64x128xi32>
    %16 = arith.extui %15 : vector<64x128xi1> to vector<64x128xi32>
    %17 = arith.sitofp %16 : vector<64x128xi32> to vector<64x128xf32>
    %c0_5 = arith.constant 0 : index
    %c0_6 = arith.constant 0 : index
    %18 = vector.load %arg4[%c0_5, %c0_6] : memref<32x64xf32, #tpu.memory_space<vmem>>, vector<32x64xf32>
    %c0_7 = arith.constant 0 : index
    %c0_8 = arith.constant 0 : index
    %19 = vector.load %arg5[%c0_7, %c0_8] : memref<32x64xf32, #tpu.memory_space<vmem>>, vector<32x64xf32>
    %cst = arith.constant dense<0.000000e+00> : vector<32x128xf32>
    %20 = tpu.matmul %18, %7, %cst {dimension_numbers = #tpu.dot_dimension_numbers<[1], [0], [0], [1], [0, 0, 1, 1], [], []>, precision = #tpu.contract_precision<fp32>} : vector<32x64xf32>, vector<64x128xf32>, vector<32x128xf32> -> vector<32x128xf32>
    %cst_9 = arith.constant dense<0.000000e+00> : vector<32x128xf32>
    %21 = tpu.matmul %19, %12, %cst_9 {dimension_numbers = #tpu.dot_dimension_numbers<[1], [0], [0], [1], [0, 0, 1, 1], [], []>, precision = #tpu.contract_precision<fp32>} : vector<32x64xf32>, vector<64x128xf32>, vector<32x128xf32> -> vector<32x128xf32>
    %cst_10 = arith.constant dense<0.000000e+00> : vector<32x128xf32>
    %22 = tpu.matmul %19, %17, %cst_10 {dimension_numbers = #tpu.dot_dimension_numbers<[1], [0], [0], [1], [0, 0, 1, 1], [], []>, precision = #tpu.contract_precision<fp32>} : vector<32x64xf32>, vector<64x128xf32>, vector<32x128xf32> -> vector<32x128xf32>
    %23 = arith.mulf %20, %21 : vector<32x128xf32>
    %cst_11 = arith.constant dense<0.000000e+00> : vector<128xf32>
    %24 = vector.multi_reduction <add>, %23, %cst_11 [0] : vector<32x128xf32> to vector<128xf32>
    %25 = vector.shape_cast %24 : vector<128xf32> to vector<1x128xf32>
    %26 = arith.mulf %20, %22 : vector<32x128xf32>
    %cst_12 = arith.constant dense<0.000000e+00> : vector<128xf32>
    %27 = vector.multi_reduction <add>, %26, %cst_12 [0] : vector<32x128xf32> to vector<128xf32>
    %28 = vector.shape_cast %27 : vector<128xf32> to vector<1x128xf32>
    %29 = tpu.concatenate %25, %28 in 0 : vector<1x128xf32>, vector<1x128xf32> -> vector<2x128xf32>
    %c0_13 = arith.constant 0 : index
    %c0_14 = arith.constant 0 : index
    %30 = vector.load %arg6[%c0_13, %c0_14] : memref<2x128xf32, #tpu.memory_space<vmem>>, vector<2x128xf32>
    tpu.vector_store %arg6[%c0_13, %c0_14], %29 {strides = array<i32>} : memref<2x128xf32, #tpu.memory_space<vmem>>, vector<2x128xf32>,
    return
  }
  func.func @transform_0(%arg0: i32) -> (i32, i32) {
    %c0_i32 = arith.constant 0 : i32
    %c0_i32_0 = arith.constant 0 : i32
    return %c0_i32, %arg0 : i32, i32
  }
  func.func @transform_1(%arg0: i32) -> (i32, i32) {
    %c0_i32 = arith.constant 0 : i32
    %c0_i32_0 = arith.constant 0 : i32
    return %c0_i32, %arg0 : i32, i32
  }
  func.func @transform_2(%arg0: i32) -> (i32, i32) {
    %c0_i32 = arith.constant 0 : i32
    %c0_i32_0 = arith.constant 0 : i32
    return %c0_i32, %arg0 : i32, i32
  }
  func.func @transform_3(%arg0: i32) -> (i32, i32) {
    %c0_i32 = arith.constant 0 : i32
    %c0_i32_0 = arith.constant 0 : i32
    %c0_i32_1 = arith.constant 0 : i32
    return %c0_i32, %c0_i32_0 : i32, i32
  }
  func.func @transform_4(%arg0: i32) -> (i32, i32) {
    %c0_i32 = arith.constant 0 : i32
    %c0_i32_0 = arith.constant 0 : i32
    %c0_i32_1 = arith.constant 0 : i32
    return %c0_i32, %c0_i32_0 : i32, i32
  }
  func.func @transform_5(%arg0: i32) -> (i32, i32) {
    %c0_i32 = arith.constant 0 : i32
    %c0_i32_0 = arith.constant 0 : i32
    return %c0_i32, %arg0 : i32, i32
  }
}

</mosaic_0001>

<bundles_post_ra>
// kernel: bpr_forward.1
= control target key start
LH: loop header
LB: loop body
LE: loop exit
PB: predicated region body
PF: predicated region fallthrough
CT: control target
= control target key end

     0   :  { %10 = vsyncpa [#allocation3], 0  ;;  %s3283_s18 = smov [#allocation2]   ;;  %s4129_s0 = inlined_call_operand.vmem [shape: s32[1,128], index: 0, kind: input, shape index: {}]   ;;  %s4130_s1 = inlined_call_operand.vmem [shape: s32[1,128], index: 1, kind: input, shape index: {}]   ;;  %s4131_s2 = inlined_call_operand.vmem [shape: s32[1,128], index: 2, kind: input, shape index: {}]   ;;  %s4132_s3 = inlined_call_operand.vmem [shape: f32[32,64], index: 3, kind: input, shape index: {}]   ;;  %s4133_s4 = inlined_call_operand.hbm [shape: f32[32,64], index: 4, kind: input, shape index: {}]   ;;  %s4134_s5 = inlined_call_operand.vmem [shape: f32[2,128], index: 5, kind: output, shape index: {}]  }
   0x1   :  { %s24_s19 = sshll.u32 %s3283_s18, 4  ;;  %s3259_s22 = scalar_lea.hbm %s4133_s4, 512  ;;  %s25_s19 = int_to_ptr.vmem [resolvable:$true] %s24_s19 }
   0x2   :  { %p3260_p0 = scmp.ne.s32.totalorder %s4133_s4, %s3259_s22  ;;  %p3263_p1 = scmp.lt.u32.totalorder %s3259_s22, %s4133_s4 }
   0x4   :  { %p3265_p2 = pnand %p3263_p1, %p3260_p0 }
   0x6   :  { %3268 = shalt.err (!%p3265_p2)
}
   0x7   :  { %s3269_s27 = scalar_lea.vmem %s25_s19, 512  ;;  %p3274_p4 = scmp.lt.s32.totalorder %s25_s19, %s25_s19 }
   0x8   :  { %p3270_p3 = scmp.ne.s32.totalorder %s25_s19, %s3269_s27  ;;  %p3275_p5 = scmp.lt.s32.totalorder %s3269_s27, %s3269_s27 }
   0xa   :  { %p3276_p6 = por %p3275_p5, %p3274_p4 }
   0xc   :  { %p3277_p7 = pnand %p3276_p6, %p3270_p3 }
   0xe   :  { %3280 = shalt.err (!%p3277_p7)
}
   0xf   :  { %s3284_s28 = smov 128   ;;  %s3285_s29 = smov 8  }
  0x10   :  { %30 = dma.hbm_to_vmem [thread:$0]  %s4133_s4, 512, %s25_s19, [#allocation3], %s3284_s28, %s3284_s28, %s3285_s29  }
  0x11   :  { %3281 = dma.done.wait [#allocation3], 512  }
  0x12   :  { %3282 = vsyncadd [#allocation3], 4294966784  ;;  %v37_v0 = vlaneseq  ;;  %vm138_vm0 = vcmask 523264   ;;  %v2195_v6 = vld [vmem:[%s4129_s0] ss:$0 sm:$0xff]  ;;  %v3286_v11 = vmov 0.0  }
  0x13   :  { %v130_v10 = vld [vmem:[%s4132_s3] sm:$0xff]  ;;  %v3287_v17 = vmov 1.0|1.0   ;;  %v131_v27 = vld [vmem:[%s4132_s3 + $0x8] sm:$0xff]  ;;  %v132_v49 = vld [vmem:[%s4132_s3 + $0x10] sm:$0xff] }
  0x14   :  { %v3330_v1 = vshrl.u32 %v37_v0, 7  ;;  %v140_v22 = vsel %vm138_vm0, %v130_v10, 0  ;;  %v143_v37 = vsel %vm138_vm0, %v131_v27, 0  ;;  %v146_v61 = vsel %vm138_vm0, %v132_v49, 0  ;;  %v133_v62 = vld [vmem:[%s4132_s3 + $0x18] sm:$0xff] }
  0x15   :  { %v3398_v24 = vand.u32 4294901760, %v140_v22  ;;  %v3451_v42 = vand.u32 4294901760, %v143_v37 }
  0x16   :  { %v3333_v2 = vadd.s32 8, %v3330_v1  ;;  %v3336_v3 = vadd.s32 16, %v3330_v1  ;;  %v3339_v4 = vadd.s32 24, %v3330_v1  ;;  %v3342_v5 = vadd.s32 32, %v3330_v1 }
  0x17   :  { %v3348_v7 = vadd.s32 40, %v3330_v1  ;;  %v3351_v8 = vadd.s32 48, %v3330_v1  ;;  %v3354_v9 = vadd.s32 56, %v3330_v1  ;;  %vm50_vm1 = vcmp.eq.s32.totalorder %v3330_v1, %v2195_v6 }
  0x18   :  { %vm51_vm2 = vcmp.eq.s32.totalorder %v3333_v2, %v2195_v6  ;;  %vm52_vm3 = vcmp.eq.s32.totalorder %v3336_v3, %v2195_v6  ;;  %vm53_vm4 = vcmp.eq.s32.totalorder %v3339_v4, %v2195_v6  ;;  %v2196_v12 = vsel %vm50_vm1, 1.0, %v3286_v11 }
  0x19   :  { %v2197_v13 = vsel %vm51_vm2, 1.0, %v3286_v11  ;;  %vm3365_vm5 = vmpackc.low %vm51_vm2, %vm50_vm1  ;;  %v2198_v15 = vsel %vm52_vm3, 1.0, %v3286_v11  ;;  %v2199_v16 = vsel %vm53_vm4, 1.0, %v3286_v11  ;;  %v3374_v18 = vsub.f32 %v2196_v12, %v2196_v12 }
  0x1a   :  { %2907 = vmatprep.subr.msk.bf16.mxu1 %vm3365_vm5, %v3287_v17  ;;  %v3376_v19 = vsub.f32 %v2197_v13, %v2197_v13  ;;  %2955 = vmatprep.subr.msk.bf16.mxu0 %vm3365_vm5, %v3287_v17  ;;  %vm3381_vm6 = vmpackc.low %vm53_vm4, %vm52_vm3  ;;  %v3385_v21 = vsub.f32 %v2198_v15, %v2198_v15  ;;  %v3394_v23 = vsub.f32 %v2199_v16, %v2199_v16 }
  0x1b   :  { %2909 = vmatpush3.bf16.msk.msra.mxu1 %vm3365_vm5, %v3287_v17  ;;  %2957 = vmatpush3.bf16.msk.msra.mxu0 %vm3365_vm5, %v3287_v17  ;;  %vm54_vm7 = vcmp.eq.s32.totalorder %v3342_v5, %v2195_v6  ;;  %vm55_vm8 = vcmp.eq.s32.totalorder %v3348_v7, %v2195_v6  ;;  %vm56_vm9 = vcmp.eq.s32.totalorder %v3351_v8, %v2195_v6  ;;  %v267_v35 = vand.u32 4294901760, %v3374_v18 }
  0x1c   :  { %2911 = vmatprep.subr.msk.bf16.mxu1 %vm3381_vm6, %v3287_v17  ;;  %2959 = vmatprep.subr.msk.bf16.mxu0 %vm3381_vm6, %v3287_v17  ;;  %v2200_v25 = vsel %vm54_vm7, 1.0, %v3286_v11  ;;  %v2201_v26 = vsel %vm55_vm8, 1.0, %v3286_v11  ;;  %vm3412_vm10 = vmpackc.low %vm55_vm8, %vm54_vm7  ;;  %vm57_vm11 = vcmp.eq.s32.totalorder %v3354_v9, %v2195_v6  ;;  %v2202_v31 = vsel %vm56_vm9, 1.0, %v3286_v11 }
  0x1d   :  { %v3416_v29 = vsub.f32 %v2200_v25, %v2200_v25  ;;  %v3418_v30 = vsub.f32 %v2201_v26, %v2201_v26  ;;  %v2203_v32 = vsel %vm57_vm11, 1.0, %v3286_v11  ;;  %v3427_v33 = vsub.f32 %v2202_v31, %v2202_v31  ;;  %vm3458_vm12 = vmpackc.low %vm57_vm11, %vm56_vm9 }
  0x1e   :  { %v3430_v34 = vsub.f32 %v140_v22, %v3398_v24  ;;  %v274_v36 = vand.u32 4294901760, %v3376_v19  ;;  %v281_v38 = vand.u32 4294901760, %v3385_v21  ;;  %v288_v39 = vand.u32 4294901760, %v3394_v23 }
  0x1f   :  { %2913 = vmatpush3.bf16.msk.msra.mxu1 %vm3381_vm6, %v3287_v17  ;;  %2961 = vmatpush3.bf16.msk.msra.mxu0 %vm3381_vm6, %v3287_v17  ;;  %v268_v41 = vsub.f32 %v3374_v18, %v267_v35  ;;  %v295_v43 = vand.u32 4294901760, %v3416_v29  ;;  %v3462_v45 = vsub.f32 %v2203_v32, %v2203_v32  ;;  %v3472_v53 = vsub.f32 %v143_v37, %v3451_v42 }
  0x20   :  { %2915 = vmatprep.subr.msk.bf16.mxu1 %vm3412_vm10, %v3287_v17  ;;  %2963 = vmatprep.subr.msk.bf16.mxu0 %vm3412_vm10, %v3287_v17  ;;  %v226_v40 = vand.u32 4294901760, %v3430_v34  ;;  %v275_v46 = vsub.f32 %v3376_v19, %v274_v36  ;;  %v282_v47 = vsub.f32 %v3385_v21, %v281_v38  ;;  %v289_v48 = vsub.f32 %v3394_v23, %v288_v39 }
  0x21   :  { %v269_v51 = vand.u32 4294901760, %v268_v41  ;;  %v2970_v52 = vpack.c.bf16 %v274_v36, %v267_v35  ;;  %v296_v57 = vsub.f32 %v3416_v29, %v295_v43  ;;  %v236_v59 = vand.u32 4294901760, %v3472_v53 }
  0x22   :  { %v227_v50 = vsub.f32 %v3430_v34, %v226_v40  ;;  %2592 = vmatprep.mubr.f32.mxu0 %v226_v40  ;;  %v276_v54 = vand.u32 4294901760, %v275_v46  ;;  %v283_v55 = vand.u32 4294901760, %v282_v47  ;;  %v290_v56 = vand.u32 4294901760, %v289_v48 }
  0x23   :  { %2917 = vmatpush3.bf16.msk.msra.mxu1 %vm3412_vm10, %v3287_v17  ;;  %2965 = vmatpush3.bf16.msk.msra.mxu0 %vm3412_vm10, %v3287_v17  ;;  %v302_v60 = vand.u32 4294901760, %v3418_v30  ;;  %v2974_v0 = vpack.c.bf16 %v288_v39, %v281_v38  ;;  %v3493_v6 = vand.u32 4294901760, %v146_v61  ;;  %v237_v10 = vsub.f32 %v3472_v53, %v236_v59 }
  0x24   :  { %2919 = vmatprep.subr.msk.bf16.mxu1 %vm3458_vm12, %v3287_v17  ;;  %2967 = vmatprep.subr.msk.bf16.mxu0 %vm3458_vm12, %v3287_v17  ;;  %v228_v58 = vand.u32 4294901760, %v227_v50  ;;  %v2922_v63 = vpack.c.bf16 %v276_v54, %v269_v51  ;;  %v2926_v12 = vpack.c.bf16 %v290_v56, %v283_v55  ;;  %v309_v15 = vand.u32 4294901760, %v3427_v33  ;;  %v3527_v55 = vld [vmem:[%s4130_s1] ss:$0 sm:$0xff] }
  0x25   :  { %v303_v13 = vsub.f32 %v3418_v30, %v302_v60  ;;  %v297_v16 = vand.u32 4294901760, %v296_v57  ;;  %v3505_v22 = vsub.f32 %v146_v61, %v3493_v6  ;;  %v316_v25 = vand.u32 4294901760, %v3462_v45  ;;  %v3532_v56 = vld [vmem:[%s4131_s2] ss:$0 sm:$0xff] }
  0x26   :  { %2526 = vmatprep.mubr.f32.mxu1 %v228_v58  ;;  %v149_v26 = vsel %vm138_vm0, %v133_v62, 0  ;;  %v238_v27 = vand.u32 4294901760, %v237_v10  ;;  %v310_v32 = vsub.f32 %v3427_v33, %v309_v15  ;;  %v2978_v39 = vpack.c.bf16 %v302_v60, %v295_v43  ;;  %v134_v57 = vld [vmem:[#allocation2] sm:$0xff] }
  0x27   :  { %2921 = vmatpush3.bf16.msk.msra.mxu1 %vm3458_vm12, %v3287_v17  ;;  %2969 = vmatpush3.bf16.msk.msra.mxu0 %vm3458_vm12, %v3287_v17  ;;  %v304_v31 = vand.u32 4294901760, %v303_v13  ;;  %v3510_v35 = vand.u32 4294901760, %v149_v26  ;;  %v246_v36 = vand.u32 4294901760, %v3505_v22  ;;  %v317_v37 = vsub.f32 %v3462_v45, %v316_v25  ;;  %v135_v13 = vld [vmem:[#allocation2 + $0x8] sm:$0xff] }
  0x28   :  { %2923 = vmatprep.subr.bf16.mxu1 %v2922_v63  ;;  %2971 = vmatprep.subr.bf16.mxu0 %v2970_v52  ;;  %v311_v46 = vand.u32 4294901760, %v310_v32  ;;  %v2982_v43 = vpack.c.bf16 %v316_v25, %v309_v15  ;;  %v2938_v54 = vpack.c.bf16 %v3376_v19, %v3374_v18  ;;  %v2942_v18 = vpack.c.bf16 %v3394_v23, %v3385_v21  ;;  %v136_v32 = vld [vmem:[#allocation2 + $0x10] sm:$0xff] }
  0x29   :  { %v3515_v38 = vsub.f32 %v149_v26, %v3510_v35  ;;  %v247_v40 = vsub.f32 %v3505_v22, %v246_v36  ;;  %v2930_v41 = vpack.c.bf16 %v304_v31, %v297_v16  ;;  %v318_v47 = vand.u32 4294901760, %v317_v37 }
  0x2a   :  { %2527 = vmatmul.mubr.f32.vlgmr.msra.gmra.mrb[0].mxu1 %v238_v27  ;;  %2593 = vmatmul.mubr.f32.vlgmr.msra.gmra.mrb[0].mxu0 %v236_v59  ;;  %vm78_vm13 = vcmp.eq.s32.totalorder %v3330_v1, %v3527_v55  ;;  %vm79_vm14 = vcmp.eq.s32.totalorder %v3333_v2, %v3527_v55  ;;  %vm106_vm15 = vcmp.eq.s32.totalorder %v3330_v1, %v3532_v56  ;;  %v818_v23 = vsel %vm138_vm0, %v134_v57, 0 }
  0x2b   :  { %2925 = vmatpush3.bf16.msra.mxu1 %v2922_v63  ;;  %2973 = vmatpush3.bf16.msra.mxu0 %v2970_v52  ;;  %v256_v48 = vand.u32 4294901760, %v3515_v38  ;;  %v248_v49 = vand.u32 4294901760, %v247_v40  ;;  %v2934_v51 = vpack.c.bf16 %v318_v47, %v311_v46  ;;  %v2205_v19 = vsel %vm78_vm13, 1.0, %v3286_v11 }
  0x2c   :  { %2927 = vmatprep.subr.bf16.mxu1 %v2926_v12  ;;  %2975 = vmatprep.subr.bf16.mxu0 %v2974_v0  ;;  %v2206_v58 = vsel %vm79_vm14, 1.0, %v3286_v11  ;;  %vm107_vm1 = vcmp.eq.s32.totalorder %v3333_v2, %v3532_v56  ;;  %v2214_v21 = vsel %vm106_vm15, 1.0, %v3286_v11  ;;  %vm80_vm2 = vcmp.eq.s32.totalorder %v3336_v3, %v3527_v55 }
  0x2d   :  { %2595 = vmatprep.mubr.f32.mxu0 %v246_v36  ;;  %v257_v50 = vsub.f32 %v3515_v38, %v256_v48  ;;  %2529 = vmatprep.mubr.f32.mxu1 %v248_v49  ;;  %v2215_v59 = vsel %vm107_vm1, 1.0, %v3286_v11  ;;  %v2207_v60 = vsel %vm80_vm2, 1.0, %v3286_v11  ;;  %v2946_v61 = vpack.c.bf16 %v3418_v30, %v3416_v29 }
  0x2e   :  { %2596 = vmatmul.mubr.f32.gmra.mrb[2].mxu0 %v256_v48  ;;  %v2950_v14 = vpack.c.bf16 %v3462_v45, %v3427_v33  ;;  %v3584_v62 = vsub.f32 %v2205_v19, %v2205_v19  ;;  %v3586_v63 = vsub.f32 %v2206_v58, %v2206_v58  ;;  %v3590_v10 = vand.u32 4294901760, %v818_v23 }
  0x2f   :  { %2929 = vmatpush3.bf16.msra.mxu1 %v2926_v12  ;;  %2977 = vmatpush3.bf16.msra.mxu0 %v2974_v0  ;;  %v258_v52 = vand.u32 4294901760, %v257_v50  ;;  %v3588_v0 = vsub.f32 %v2214_v21, %v2214_v21  ;;  %v3594_v29 = vsub.f32 %v2215_v59, %v2215_v59  ;;  %vm81_vm3 = vcmp.eq.s32.totalorder %v3339_v4, %v3527_v55  ;;  %v137_v50 = vld [vmem:[#allocation2 + $0x18] sm:$0xff] }
  0x30   :  { %2931 = vmatprep.subr.bf16.mxu1 %v2930_v41  ;;  %2979 = vmatprep.subr.bf16.mxu0 %v2978_v39  ;;  %v3598_v30 = vsub.f32 %v2207_v60, %v2207_v60  ;;  %v2208_v33 = vsel %vm81_vm3, 1.0, %v3286_v11  ;;  %vm108_vm4 = vcmp.eq.s32.totalorder %v3336_v3, %v3532_v56  ;;  %vm82_vm7 = vcmp.eq.s32.totalorder %v3342_v5, %v3527_v55 }
  0x31   :  { %2614 = vmatprep.mubr.f32.mxu0 %v3398_v24  ;;  %2530 = vmatmul.mubr.f32.gmra.mrb[2].mxu1 %v258_v52  ;;  %v2216_v20 = vsel %vm108_vm4, 1.0, %v3286_v11  ;;  %v2209_v12 = vsel %vm82_vm7, 1.0, %v3286_v11  ;;  %vm110_vm8 = vcmp.eq.s32.totalorder %v3342_v5, %v3532_v56  ;;  %vm111_vm9 = vcmp.eq.s32.totalorder %v3348_v7, %v3532_v56 }
  0x32   :  { %2548 = vmatprep.mubr.f32.mxu1 %v3398_v24  ;;  %v3641_v16 = vsub.f32 %v818_v23, %v3590_v10  ;;  %vm84_vm11 = vcmp.eq.s32.totalorder %v3351_v8, %v3527_v55  ;;  %v945_v26 = vand.u32 4294901760, %v3584_v62  ;;  %v952_v27 = vand.u32 4294901760, %v3586_v63 }
  0x33   :  { %2933 = vmatpush3.bf16.msra.mxu1 %v2930_v41  ;;  %2981 = vmatpush3.bf16.msra.mxu0 %v2978_v39  ;;  %v2211_v25 = vsel %vm84_vm11, 1.0, %v3286_v11  ;;  %v821_v31 = vsel %vm138_vm0, %v135_v13, 0  ;;  %v3678_v36 = vsub.f32 %v2208_v33, %v2208_v33  ;;  %v3680_v37 = vsub.f32 %v2216_v20, %v2216_v20 }
  0x34   :  { %2935 = vmatprep.subr.bf16.mxu1 %v2934_v51  ;;  %2983 = vmatprep.subr.bf16.mxu0 %v2982_v43  ;;  %v3698_v46 = vsub.f32 %v2209_v12, %v2209_v12  ;;  %v3705_v49 = vand.u32 4294901760, %v3641_v16  ;;  %v3709_v1 = vsub.f32 %v2211_v25, %v2211_v25  ;;  %v824_v2 = vsel %vm138_vm0, %v136_v32, 0 }
  0x35   :  { %v953_v57 = vsub.f32 %v3586_v63, %v952_v27  ;;  %v4147_v44 = vand.u32 4294901760, %v3588_v0  ;;  %v4143_v19 = vand.u32 4294901760, %v3598_v30  ;;  %v827_v58 = vsel %vm138_vm0, %v137_v50, 0 }
  0x36   :  { %v905_v23 = vsub.f32 %v3641_v16, %v3705_v49  ;;  %v4142_v59 = vand.u32 4294901760, %v3678_v36  ;;  %v4137_v60 = vand.u32 4294901760, %v3680_v37 }
  0x37   :  { %2937 = vmatpush3.bf16.msra.mxu1 %v2934_v51  ;;  %2985 = vmatpush3.bf16.msra.mxu0 %v2982_v43  ;;  %v3711_v43 = vand.u32 4294901760, %v821_v31  ;;  %v954_v12 = vand.u32 4294901760, %v953_v57 }
  0x38   :  { %2939 = vmatprep.subr.bf16.mxu1 %v2938_v54  ;;  %2987 = vmatprep.subr.msk.bf16.mxu0 %vm3365_vm5, %v3287_v17 }
  0x3a   :  { %2549 = vmatmul.mubr.f32.vlgmr.msra.gmra.mrb[0].mxu1 %v3451_v42  ;;  %2615 = vmatmul.mubr.f32.vlgmr.msra.gmra.mrb[0].mxu0 %v3451_v42 }
  0x3b   :  { %2941 = vmatpush3.bf16.msra.mxu1 %v2938_v54  ;;  %2989 = vmatpush3.bf16.msk.msra.mxu0 %vm3365_vm5, %v3287_v17  ;;  %vm109_vm5 = vcmp.eq.s32.totalorder %v3339_v4, %v3532_v56  ;;  %v946_v54 = vsub.f32 %v3584_v62, %v945_v26 }
  0x3c   :  { %2943 = vmatprep.subr.bf16.mxu1 %v2942_v18  ;;  %2991 = vmatprep.subr.msk.bf16.mxu0 %vm3381_vm6, %v3287_v17  ;;  %v2217_v45 = vsel %vm109_vm5, 1.0, %v3286_v11  ;;  %vm3759_vm0 = vmpackc.low %vm109_vm5, %vm108_vm4 }
  0x3d   :  { %2551 = vmatprep.mubr.f32.mxu1 %v3493_v6  ;;  %2617 = vmatprep.mubr.f32.mxu0 %v3493_v6  ;;  %v3682_v39 = vsub.f32 %v2217_v45, %v2217_v45  ;;  %v947_v33 = vand.u32 4294901760, %v946_v54 }
  0x3e   :  { %2552 = vmatmul.mubr.f32.gmra.mrb[2].mxu1 %v3510_v35  ;;  %2618 = vmatmul.mubr.f32.gmra.mrb[2].mxu0 %v3510_v35 }
  0x3f   :  { %2945 = vmatpush3.bf16.msra.mxu1 %v2942_v18  ;;  %2993 = vmatpush3.bf16.msk.msra.mxu0 %vm3381_vm6, %v3287_v17  ;;  %vm4135_vm6 = vcmp.eq.s32.totalorder %v3348_v7, %v3527_v55  ;;  %v4146_v18 = vand.u32 4294901760, %v3594_v29  ;;  %v4136_v20 = vand.u32 4294901760, %v3682_v39  ;;  %v3018_v57 = vpack.c.bf16 %v954_v12, %v947_v33 }
  0x40   :  { %2947 = vmatprep.subr.bf16.mxu1 %v2946_v61  ;;  %2995 = vmatprep.subr.msk.bf16.mxu0 %vm3412_vm10, %v3287_v17  ;;  %v2210_v15 = vsel %vm4135_vm6, 1.0, %v3286_v11  ;;  %vm85_vm6 = vcmp.eq.s32.totalorder %v3354_v9, %v3527_v55 }
  0x41   :  { %2570 = vmatprep.mubr.f32.mxu1 %v3430_v34  ;;  %2636 = vmatprep.mubr.f32.mxu0 %v3398_v24  ;;  %v2218_v34 = vsel %vm110_vm8, 1.0, %v3286_v11  ;;  %v2219_v24 = vsel %vm111_vm9, 1.0, %v3286_v11  ;;  %v2212_v40 = vsel %vm85_vm6, 1.0, %v3286_v11  ;;  %v3700_v47 = vsub.f32 %v2210_v15, %v2210_v15  ;;  %vm3868_vm4 = vmpackc.low %vm85_vm6, %vm84_vm11 }
  0x42   :  { %v3702_v48 = vsub.f32 %v2218_v34, %v2218_v34  ;;  %v3707_v51 = vsub.f32 %v2219_v24, %v2219_v24  ;;  %v3717_v52 = vsub.f32 %v2212_v40, %v2212_v40  ;;  %v906_v15 = vand.u32 4294901760, %v905_v23 }
  0x43   :  { %2949 = vmatpush3.bf16.msra.mxu1 %v2946_v61  ;;  %2997 = vmatpush3.bf16.msk.msra.mxu0 %vm3412_vm10, %v3287_v17  ;;  %vm3674_vm10 = vmpackc.low %vm79_vm14, %vm78_vm13  ;;  %v3749_v61 = vand.u32 4294901760, %v824_v2  ;;  %vm112_vm14 = vcmp.eq.s32.totalorder %v3351_v8, %v3532_v56  ;;  %v967_v34 = vsub.f32 %v3678_v36, %v4142_v59  ;;  %v1626_v24 = vsub.f32 %v3680_v37, %v4137_v60 }
  0x44   :  { %2951 = vmatprep.subr.bf16.mxu1 %v2950_v14  ;;  %2999 = vmatprep.subr.msk.bf16.mxu0 %vm3458_vm12, %v3287_v17  ;;  %vm3694_vm13 = vmpackc.low %vm107_vm1, %vm106_vm15  ;;  %vm113_vm15 = vcmp.eq.s32.totalorder %v3354_v9, %v3532_v56  ;;  %v2220_v3 = vsel %vm112_vm14, 1.0, %v3286_v11  ;;  %vm4164_vm1 = vcmp.eq.s32.totalorder %v3348_v7, %v3527_v55  ;;  %v4141_v7 = vand.u32 4294901760, %v3698_v46 }
  0x45   :  { %v2221_v4 = vsel %vm113_vm15, 1.0, %v3286_v11  ;;  %v1612_v11 = vsub.f32 %v3588_v0, %v4147_v44  ;;  %v3831_v25 = vsub.f32 %v824_v2, %v3749_v61  ;;  %v4138_v40 = vand.u32 4294901760, %v3702_v48  ;;  %vm3880_vm5 = vmpackc.low %vm113_vm15, %vm112_vm14 }
  0x46   :  { %v4139_v50 = vand.u32 4294901760, %v3707_v51  ;;  %v3872_v54 = vsub.f32 %v2221_v4, %v2221_v4  ;;  %v1627_v60 = vand.u32 4294901760, %v1626_v24  ;;  %v974_v8 = vsub.f32 %v3698_v46, %v4141_v7 }
  0x47   :  { %2953 = vmatpush3.bf16.msra.mxu1 %v2950_v14  ;;  %3001 = vmatpush3.bf16.msk.msra.mxu0 %vm3458_vm12, %v3287_v17  ;;  %vm3741_vm12 = vmpackc.low %vm81_vm3, %vm80_vm2  ;;  %v3885_v4 = vand.u32 4294901760, %v3831_v25 }
  0x48   :  { %3003 = vmatprep.subr.msk.bf16.mxu1 %vm3674_vm10, %v3287_v17  ;;  %3099 = vmatprep.subr.msk.bf16.mxu0 %vm3694_vm13, %v3287_v17  ;;  %vm3795_vm2 = vmpackc.low %vm4164_vm1, %vm82_vm7  ;;  %v975_v7 = vand.u32 4294901760, %v974_v8  ;;  %vm2187_vm7 = vcmask 1040384  }
  0x49   :  { %vm3820_vm3 = vmpackc.low %vm111_vm9, %vm110_vm8 }
  0x4a   :  { %2571 = vmatmul.mubr.f32.vlgmr.msra.gmra.mrb[0].mxu1 %v3472_v53  ;;  %2637 = vmatmul.mubr.f32.vlgmr.msra.gmra.mrb[0].mxu0 %v3451_v42  ;;  %v3768_v53 = vsub.f32 %v821_v31, %v3711_v43  ;;  %v3770_v42 = vand.u32 4294901760, %v827_v58  ;;  %v4140_v31 = vand.u32 4294901760, %v3700_v47 }
  0x4b   :  { %3005 = vmatpush3.bf16.msk.msra.mxu1 %vm3674_vm10, %v3287_v17  ;;  %3101 = vmatpush3.bf16.msk.msra.mxu0 %vm3694_vm13, %v3287_v17 }
  0x4c   :  { %2573 = vmatprep.mubr.f32.mxu1 %v3505_v22  ;;  %2639 = vmatprep.mubr.f32.mxu0 %v3493_v6  ;;  %v1619_v22 = vsub.f32 %v3594_v29, %v4146_v18  ;;  %v960_v6 = vsub.f32 %v3598_v30, %v4143_v19  ;;  %v3836_v5 = vand.u32 4294901760, %v3768_v53  ;;  %v3841_v32 = vsub.f32 %v827_v58, %v3770_v42 }
  0x4d   :  { %3007 = vmatprep.subr.msk.bf16.mxu1 %vm3741_vm12, %v3287_v17  ;;  %3103 = vmatprep.subr.msk.bf16.mxu0 %vm3759_vm0, %v3287_v17  ;;  %v1613_v58 = vand.u32 4294901760, %v1612_v11  ;;  %v981_v9 = vsub.f32 %v3700_v47, %v4140_v31  ;;  %v1640_v11 = vsub.f32 %v3702_v48, %v4138_v40 }
  0x4e   :  { %2574 = vmatmul.mubr.f32.gmra.mrb[2].mxu1 %v3515_v38  ;;  %2640 = vmatmul.mubr.f32.gmra.mrb[2].mxu0 %v3510_v35  ;;  %v3849_v38 = vsub.f32 %v2220_v3, %v2220_v3  ;;  %v1633_v35 = vsub.f32 %v3682_v39, %v4136_v20  ;;  %v1620_v23 = vand.u32 4294901760, %v1619_v22  ;;  %v961_v55 = vand.u32 4294901760, %v960_v6 }
  0x4f   :  { %3009 = vmatpush3.bf16.msk.msra.mxu1 %vm3741_vm12, %v3287_v17  ;;  %3105 = vmatpush3.bf16.msk.msra.mxu0 %vm3759_vm0, %v3287_v17  ;;  %v968_v20 = vand.u32 4294901760, %v967_v34  ;;  %v915_v33 = vsub.f32 %v3768_v53, %v3836_v5  ;;  %v3896_v56 = vand.u32 4294901760, %v3841_v32  ;;  %v1647_v22 = vsub.f32 %v3707_v51, %v4139_v50 }
  0x50   :  { %3011 = vmatprep.subr.msk.bf16.mxu1 %vm3795_vm2, %v3287_v17  ;;  %3107 = vmatprep.subr.msk.bf16.mxu0 %vm3820_vm3, %v3287_v17  ;;  %v1634_v12 = vand.u32 4294901760, %v1633_v35  ;;  %v4144_v6 = vand.u32 4294901760, %v3709_v1  ;;  %v4145_v34 = vand.u32 4294901760, %v3717_v52  ;;  %v1653_v24 = vand.u32 4294901760, %v3849_v38 }
  0x51   :  { %2658 = vmatprep.mubr.f32.mxu1 %v906_v15  ;;  %2790 = vmatprep.mubr.f32.mxu0 %v906_v15  ;;  %v3114_v15 = vpack.c.bf16 %v1620_v23, %v1613_v58  ;;  %v1660_v35 = vand.u32 4294901760, %v3872_v54  ;;  %v3022_v40 = vpack.c.bf16 %v968_v20, %v961_v55  ;;  %v925_v50 = vsub.f32 %v3831_v25, %v3885_v4 }
  0x52   :  { %v916_v31 = vand.u32 4294901760, %v915_v33  ;;  %v982_v59 = vand.u32 4294901760, %v981_v9  ;;  %v935_v19 = vsub.f32 %v3841_v32, %v3896_v56  ;;  %v3118_v58 = vpack.c.bf16 %v1634_v12, %v1627_v60 }
  0x53   :  { %3013 = vmatpush3.bf16.msk.msra.mxu1 %vm3795_vm2, %v3287_v17  ;;  %3109 = vmatpush3.bf16.msk.msra.mxu0 %vm3820_vm3, %v3287_v17  ;;  %v1641_v23 = vand.u32 4294901760, %v1640_v11  ;;  %v1648_v20 = vand.u32 4294901760, %v1647_v22  ;;  %v988_v55 = vsub.f32 %v3709_v1, %v4144_v6  ;;  %v995_v33 = vsub.f32 %v3717_v52, %v4145_v34 }
  0x54   :  { %3015 = vmatprep.subr.msk.bf16.mxu1 %vm3868_vm4, %v3287_v17  ;;  %3111 = vmatprep.subr.msk.bf16.mxu0 %vm3880_vm5, %v3287_v17  ;;  %v1654_v8 = vsub.f32 %v3849_v38, %v1653_v24  ;;  %v1661_v60 = vsub.f32 %v3872_v54, %v1660_v35  ;;  %v926_v9 = vand.u32 4294901760, %v925_v50  ;;  %v936_v12 = vand.u32 4294901760, %v935_v19 }
  0x55   :  { %v3026_v11 = vpack.c.bf16 %v982_v59, %v975_v7  ;;  %v3122_v22 = vpack.c.bf16 %v1648_v20, %v1641_v23  ;;  %v989_v6 = vand.u32 4294901760, %v988_v55  ;;  %v996_v34 = vand.u32 4294901760, %v995_v33 }
  0x56   :  { %v1655_v18 = vand.u32 4294901760, %v1654_v8  ;;  %v1662_v44 = vand.u32 4294901760, %v1661_v60  ;;  %v3034_v59 = vpack.c.bf16 %v3586_v63, %v3584_v62  ;;  %v3130_v7 = vpack.c.bf16 %v3594_v29, %v3588_v0 }
  0x57   :  { %3017 = vmatpush3.bf16.msk.msra.mxu1 %vm3868_vm4, %v3287_v17  ;;  %3113 = vmatpush3.bf16.msk.msra.mxu0 %vm3880_vm5, %v3287_v17  ;;  %v3138_v50 = vpack.c.bf16 %v3707_v51, %v3702_v48  ;;  %v4175_v62 = vand.u32 4294901760, %v3598_v30  ;;  %v4176_v63 = vand.u32 4294901760, %v3678_v36 }
  0x58   :  { %3019 = vmatprep.subr.bf16.mxu1 %v3018_v57  ;;  %3115 = vmatprep.subr.bf16.mxu0 %v3114_v15  ;;  %v3126_v19 = vpack.c.bf16 %v1662_v44, %v1655_v18  ;;  %v3038_v44 = vpack.c.bf16 %v3678_v36, %v3598_v30  ;;  %v3134_v18 = vpack.c.bf16 %v3682_v39, %v3680_v37  ;;  %v4180_v30 = vand.u32 4294901760, %v3700_v47 }
  0x59   :  { %v4181_v36 = vand.u32 4294901760, %v3702_v48  ;;  %v3174_v48 = vpack.c.bf16 %v1660_v35, %v1653_v24 }
  0x5a   :  { %2659 = vmatmul.mubr.f32.vlgmr.msra.gmra.mrb[4].mxu1 %v916_v31  ;;  %2791 = vmatmul.mubr.f32.vlgmr.msra.gmra.mrb[4].mxu0 %v916_v31  ;;  %v3030_v31 = vpack.c.bf16 %v996_v34, %v989_v6  ;;  %v3142_v6 = vpack.c.bf16 %v3872_v54, %v3849_v38 }
  0x5b   :  { %3021 = vmatpush3.bf16.msra.mxu1 %v3018_v57  ;;  %3117 = vmatpush3.bf16.msra.mxu0 %v3114_v15  ;;  %v3046_v57 = vpack.c.bf16 %v3717_v52, %v3709_v1 }
  0x5c   :  { %3023 = vmatprep.subr.bf16.mxu1 %v3022_v40  ;;  %3119 = vmatprep.subr.bf16.mxu0 %v3118_v58 }
  0x5d   :  { %2661 = vmatprep.mubr.f32.mxu1 %v926_v9  ;;  %2793 = vmatprep.mubr.f32.mxu0 %v926_v9 }
  0x5e   :  { %2662 = vmatmul.mubr.f32.gmra.mrb[6].mxu1 %v936_v12  ;;  %2794 = vmatmul.mubr.f32.gmra.mrb[6].mxu0 %v936_v12 }
  0x5f   :  { %3025 = vmatpush3.bf16.msra.mxu1 %v3022_v40  ;;  %3121 = vmatpush3.bf16.msra.mxu0 %v3118_v58  ;;  %v3042_v40 = vpack.c.bf16 %v3700_v47, %v3698_v46 }
  0x60   :  { %3027 = vmatprep.subr.bf16.mxu1 %v3026_v11  ;;  %3123 = vmatprep.subr.bf16.mxu0 %v3122_v22 }
  0x61   :  { %2680 = vmatprep.mubr.f32.mxu1 %v3590_v10  ;;  %2812 = vmatprep.mubr.f32.mxu0 %v3590_v10 }
  0x63   :  { %3029 = vmatpush3.bf16.msra.mxu1 %v3026_v11  ;;  %3125 = vmatpush3.bf16.msra.mxu0 %v3122_v22 }
  0x64   :  { %3031 = vmatprep.subr.bf16.mxu1 %v3030_v31  ;;  %3127 = vmatprep.subr.bf16.mxu0 %v3126_v19 }
  0x67   :  { %3033 = vmatpush3.bf16.msra.mxu1 %v3030_v31  ;;  %3129 = vmatpush3.bf16.msra.mxu0 %v3126_v19 }
  0x68   :  { %3035 = vmatprep.subr.bf16.mxu1 %v3034_v59  ;;  %3131 = vmatprep.subr.bf16.mxu0 %v3130_v7 }
  0x6a   :  { %2681 = vmatmul.mubr.f32.vlgmr.msra.gmra.mrb[4].mxu1 %v3711_v43  ;;  %2813 = vmatmul.mubr.f32.vlgmr.msra.gmra.mrb[4].mxu0 %v3711_v43 }
  0x6b   :  { %3037 = vmatpush3.bf16.msra.mxu1 %v3034_v59  ;;  %3133 = vmatpush3.bf16.msra.mxu0 %v3130_v7 }
  0x6c   :  { %3039 = vmatprep.subr.bf16.mxu1 %v3038_v44  ;;  %3135 = vmatprep.subr.bf16.mxu0 %v3134_v18 }
  0x6d   :  { %2683 = vmatprep.mubr.f32.mxu1 %v3749_v61  ;;  %2815 = vmatprep.mubr.f32.mxu0 %v3749_v61 }
  0x6e   :  { %2684 = vmatmul.mubr.f32.gmra.mrb[6].mxu1 %v3770_v42  ;;  %2816 = vmatmul.mubr.f32.gmra.mrb[6].mxu0 %v3770_v42 }
  0x6f   :  { %3041 = vmatpush3.bf16.msra.mxu1 %v3038_v44  ;;  %3137 = vmatpush3.bf16.msra.mxu0 %v3134_v18 }
  0x70   :  { %3043 = vmatprep.subr.bf16.mxu1 %v3042_v40  ;;  %3139 = vmatprep.subr.bf16.mxu0 %v3138_v50 }
  0x71   :  { %2702 = vmatprep.mubr.f32.mxu1 %v3641_v16  ;;  %2834 = vmatprep.mubr.f32.mxu0 %v3641_v16  ;;  %v3066_v16 = vpack.c.bf16 %v952_v27, %v945_v26  ;;  %v3070_v26 = vpack.c.bf16 %v4176_v63, %v4175_v62 }
  0x73   :  { %3045 = vmatpush3.bf16.msra.mxu1 %v3042_v40  ;;  %3141 = vmatpush3.bf16.msra.mxu0 %v3138_v50 }
  0x74   :  { %3047 = vmatprep.subr.bf16.mxu1 %v3046_v57  ;;  %3143 = vmatprep.subr.bf16.mxu0 %v3142_v6 }
  0x77   :  { %3049 = vmatpush3.bf16.msra.mxu1 %v3046_v57  ;;  %3145 = vmatpush3.bf16.msra.mxu0 %v3142_v6 }
  0x78   :  { %3051 = vmatprep.subr.msk.bf16.mxu1 %vm3674_vm10, %v3287_v17  ;;  %3147 = vmatprep.subr.msk.bf16.mxu0 %vm3694_vm13, %v3287_v17 }
  0x7a   :  { %2703 = vmatmul.mubr.f32.vlgmr.msra.gmra.mrb[4].mxu1 %v3768_v53  ;;  %2835 = vmatmul.mubr.f32.vlgmr.msra.gmra.mrb[4].mxu0 %v3768_v53  ;;  %v4174_v53 = vand.u32 4294901760, %v3594_v29  ;;  %v4178_v29 = vand.u32 4294901760, %v3682_v39  ;;  %v4183_v39 = vand.u32 4294901760, %v3709_v1 }
  0x7b   :  { %3053 = vmatpush3.bf16.msk.msra.mxu1 %vm3674_vm10, %v3287_v17  ;;  %3149 = vmatpush3.bf16.msk.msra.mxu0 %vm3694_vm13, %v3287_v17 }
  0x7c   :  { %3055 = vmatprep.subr.msk.bf16.mxu1 %vm3741_vm12, %v3287_v17  ;;  %3151 = vmatprep.subr.msk.bf16.mxu0 %vm3759_vm0, %v3287_v17 }
  0x7d   :  { %2705 = vmatprep.mubr.f32.mxu1 %v3831_v25  ;;  %2837 = vmatprep.mubr.f32.mxu0 %v3831_v25 }
  0x7e   :  { %2706 = vmatmul.mubr.f32.gmra.mrb[6].mxu1 %v3841_v32  ;;  %2838 = vmatmul.mubr.f32.gmra.mrb[6].mxu0 %v3841_v32  ;;  %v4179_v32 = vand.u32 4294901760, %v3698_v46  ;;  %v4184_v46 = vand.u32 4294901760, %v3717_v52 }
  0x7f   :  { %3057 = vmatpush3.bf16.msk.msra.mxu1 %vm3741_vm12, %v3287_v17  ;;  %3153 = vmatpush3.bf16.msk.msra.mxu0 %vm3759_vm0, %v3287_v17 }
  0x80   :  { %3059 = vmatprep.subr.msk.bf16.mxu1 %vm3795_vm2, %v3287_v17  ;;  %3155 = vmatprep.subr.msk.bf16.mxu0 %vm3820_vm3, %v3287_v17  ;;  %v3074_v15 = vpack.c.bf16 %v4180_v30, %v4179_v32  ;;  %v3078_v47 = vpack.c.bf16 %v4184_v46, %v4183_v39 }
  0x81   :  { %2724 = vmatprep.mubr.f32.mxu1 %v3705_v49  ;;  %2856 = vmatprep.mubr.f32.mxu0 %v3705_v49  ;;  %v4173_v49 = vand.u32 4294901760, %v3588_v0  ;;  %v4177_v0 = vand.u32 4294901760, %v3680_v37  ;;  %v4182_v37 = vand.u32 4294901760, %v3707_v51 }
  0x83   :  { %3061 = vmatpush3.bf16.msk.msra.mxu1 %vm3795_vm2, %v3287_v17  ;;  %3157 = vmatpush3.bf16.msk.msra.mxu0 %vm3820_vm3, %v3287_v17  ;;  %v3162_v25 = vpack.c.bf16 %v4174_v53, %v4173_v49  ;;  %v3166_v27 = vpack.c.bf16 %v4178_v29, %v4177_v0  ;;  %v3170_v34 = vpack.c.bf16 %v4182_v37, %v4181_v36 }
  0x84   :  { %3063 = vmatprep.subr.msk.bf16.mxu1 %vm3868_vm4, %v3287_v17  ;;  %3159 = vmatprep.subr.msk.bf16.mxu0 %vm3880_vm5, %v3287_v17 }
  0x87   :  { %3065 = vmatpush3.bf16.msk.msra.mxu1 %vm3868_vm4, %v3287_v17  ;;  %3161 = vmatpush3.bf16.msk.msra.mxu0 %vm3880_vm5, %v3287_v17 }
  0x88   :  { %3067 = vmatprep.subr.bf16.mxu1 %v3066_v16  ;;  %3163 = vmatprep.subr.bf16.mxu0 %v3162_v25 }
  0x8a   :  { %2725 = vmatmul.mubr.f32.vlgmr.msra.gmra.mrb[4].mxu1 %v3836_v5  ;;  %2857 = vmatmul.mubr.f32.vlgmr.msra.gmra.mrb[4].mxu0 %v3836_v5 }
  0x8b   :  { %3069 = vmatpush3.bf16.msra.mxu1 %v3066_v16  ;;  %3165 = vmatpush3.bf16.msra.mxu0 %v3162_v25 }
  0x8c   :  { %3071 = vmatprep.subr.bf16.mxu1 %v3070_v26  ;;  %3167 = vmatprep.subr.bf16.mxu0 %v3166_v27 }
  0x8d   :  { %2727 = vmatprep.mubr.f32.mxu1 %v3885_v4  ;;  %2859 = vmatprep.mubr.f32.mxu0 %v3885_v4 }
  0x8e   :  { %2728 = vmatmul.mubr.f32.gmra.mrb[6].mxu1 %v3896_v56  ;;  %2860 = vmatmul.mubr.f32.gmra.mrb[6].mxu0 %v3896_v56 }
  0x8f   :  { %3073 = vmatpush3.bf16.msra.mxu1 %v3070_v26  ;;  %3169 = vmatpush3.bf16.msra.mxu0 %v3166_v27 }
  0x90   :  { %3075 = vmatprep.subr.bf16.mxu1 %v3074_v15  ;;  %3171 = vmatprep.subr.bf16.mxu0 %v3170_v34 }
  0x91   :  { %2746 = vmatprep.mubr.f32.mxu1 %v3590_v10  ;;  %2878 = vmatprep.mubr.f32.mxu0 %v3590_v10 }
  0x93   :  { %3077 = vmatpush3.bf16.msra.mxu1 %v3074_v15  ;;  %3173 = vmatpush3.bf16.msra.mxu0 %v3170_v34 }
  0x94   :  { %3079 = vmatprep.subr.bf16.mxu1 %v3078_v47  ;;  %3175 = vmatprep.subr.bf16.mxu0 %v3174_v48 }
  0x97   :  { %3081 = vmatpush3.bf16.msra.mxu1 %v3078_v47  ;;  %3177 = vmatpush3.bf16.msra.mxu0 %v3174_v48 }
  0x98   :  { %3083 = vmatprep.subr.msk.bf16.mxu1 %vm3674_vm10, %v3287_v17  ;;  %3179 = vmatprep.subr.msk.bf16.mxu0 %vm3694_vm13, %v3287_v17 }
  0x9a   :  { %2747 = vmatmul.mubr.f32.vlgmr.msra.gmra.mrb[4].mxu1 %v3711_v43  ;;  %2879 = vmatmul.mubr.f32.vlgmr.msra.gmra.mrb[4].mxu0 %v3711_v43 }
  0x9b   :  { %3085 = vmatpush3.bf16.msk.msra.mxu1 %vm3674_vm10, %v3287_v17  ;;  %3181 = vmatpush3.bf16.msk.msra.mxu0 %vm3694_vm13, %v3287_v17 }
  0x9c   :  { %3087 = vmatprep.subr.msk.bf16.mxu1 %vm3741_vm12, %v3287_v17  ;;  %3183 = vmatprep.subr.msk.bf16.mxu0 %vm3759_vm0, %v3287_v17 }
  0x9d   :  { %2749 = vmatprep.mubr.f32.mxu1 %v3749_v61  ;;  %2881 = vmatprep.mubr.f32.mxu0 %v3749_v61 }
  0x9e   :  { %2750 = vmatmul.mubr.f32.gmra.mrb[6].mxu1 %v3770_v42  ;;  %2882 = vmatmul.mubr.f32.gmra.mrb[6].mxu0 %v3770_v42 }
  0x9f   :  { %3089 = vmatpush3.bf16.msk.msra.mxu1 %vm3741_vm12, %v3287_v17  ;;  %3185 = vmatpush3.bf16.msk.msra.mxu0 %vm3759_vm0, %v3287_v17 }
  0xa0   :  { %3091 = vmatprep.subr.msk.bf16.mxu1 %vm3795_vm2, %v3287_v17  ;;  %3187 = vmatprep.subr.msk.bf16.mxu0 %vm3820_vm3, %v3287_v17 }
  0xa1   :  { %2768 = vmatprep.mubr.f32.mxu1 %v3590_v10  ;;  %2900 = vmatprep.mubr.f32.mxu0 %v3590_v10 }
  0xa3   :  { %3093 = vmatpush3.bf16.msk.msra.mxu1 %vm3795_vm2, %v3287_v17  ;;  %3189 = vmatpush3.bf16.msk.msra.mxu0 %vm3820_vm3, %v3287_v17 }
  0xa4   :  { %3095 = vmatprep.subr.msk.bf16.mxu1 %vm3868_vm4, %v3287_v17  ;;  %3191 = vmatprep.subr.msk.bf16.mxu0 %vm3880_vm5, %v3287_v17 }
  0xa7   :  { %3097 = vmatpush3.bf16.msk.msra.mxu1 %vm3868_vm4, %v3287_v17  ;;  %3193 = vmatpush3.bf16.msk.msra.mxu0 %vm3880_vm5, %v3287_v17 }
  0xaa   :  { %2769 = vmatmul.mubr.f32.vlgmr.msra.gmra.mrb[4].mxu1 %v3711_v43  ;;  %2901 = vmatmul.mubr.f32.vlgmr.msra.gmra.mrb[4].mxu0 %v3711_v43 }
  0xab   :  { %2771 = vmatprep.mubr.f32.mxu1 %v3749_v61  ;;  %2903 = vmatprep.mubr.f32.mxu0 %v3749_v61 }
  0xae   :  { %2772 = vmatmul.mubr.f32.gmra.mrb[6].mxu1 %v3770_v42  ;;  %2904 = vmatmul.mubr.f32.gmra.mrb[6].mxu0 %v3770_v42 }
 0x11d   :  { %v2572_v10 = vpop.f32.mrb[0].mxu1  ;;  %v2638_v28 = vpop.f32.mrb[0].mxu0 }
 0x11e   :  { %v3194_v41 = vadd.f32 %v2638_v28, %v2572_v10  ;;  %v477_v51 = vpop.f32.mrb[1].mxu1  ;;  %v795_v1 = vpop.f32.mrb[1].mxu0 }
 0x11f   :  { %v3195_v52 = vadd.f32 %v795_v1, %v477_v51 }
 0x121   :  { %v2575_v21 = vpop.f32.mrb[2].mxu1  ;;  %v2641_v17 = vpop.f32.mrb[2].mxu0 }
 0x122   :  { %v3196_v14 = vadd.f32 %v2641_v17, %v2575_v21  ;;  %v491_v45 = vpop.f32.mrb[3].mxu1  ;;  %v807_v13 = vpop.f32.mrb[3].mxu0 }
 0x123   :  { %v3197_v43 = vadd.f32 %v807_v13, %v491_v45 }
 0x17d   :  { %v2770_v5 = vpop.f32.mrb[4].mxu1  ;;  %v2902_v38 = vpop.f32.mrb[4].mxu0 }
 0x17e   :  { %v2162_v2 = vmul.f32 %v3194_v41, %v2770_v5  ;;  %v2175_v61 = vmul.f32 %v3194_v41, %v2902_v38  ;;  %v1473_v54 = vpop.f32.mrb[5].mxu1  ;;  %v2139_v3 = vpop.f32.mrb[5].mxu0 }
 0x17f   :  { %v2161_v4 = vmul.f32 %v3195_v52, %v1473_v54  ;;  %v2174_v42 = vmul.f32 %v3195_v52, %v2139_v3 }
 0x181   :  { %v2165_v56 = vadd.f32 %v2162_v2, %v2161_v4  ;;  %v2178_v24 = vadd.f32 %v2175_v61, %v2174_v42  ;;  %v2773_v35 = vpop.f32.mrb[6].mxu1  ;;  %v2905_v58 = vpop.f32.mrb[6].mxu0 }
 0x182   :  { %v2164_v23 = vmul.f32 %v3196_v14, %v2773_v35  ;;  %v2177_v20 = vmul.f32 %v3196_v14, %v2905_v58  ;;  %v1485_v55 = vpop.f32.mrb[7].mxu1  ;;  %v2151_v33 = vpop.f32.mrb[7].mxu0 }
 0x183   :  { %v2163_v8 = vmul.f32 %v3197_v43, %v1485_v55  ;;  %v2176_v60 = vmul.f32 %v3197_v43, %v2151_v33 }
 0x185   :  { %v2166_v9 = vadd.f32 %v2165_v56, %v2163_v8  ;;  %v2179_v12 = vadd.f32 %v2178_v24, %v2176_v60 }
 0x187   :  { %v2167_v11 = vadd.f32 %v2166_v9, %v2164_v23  ;;  %v2180_v22 = vadd.f32 %v2179_v12, %v2177_v20 }
 0x189   :  { %v2168_v31 = vrot.slane %v2167_v11, 4  ;;  %v2181_v19 = vrot.slane %v2180_v22, 4 }
 0x18b   :  { %v2169_v59 = vadd.f32 %v2168_v31, %v2167_v11  ;;  %v2182_v7 = vadd.f32 %v2181_v19, %v2180_v22 }
 0x18d   :  { %v2170_v44 = vrot.slane %v2169_v59, 2  ;;  %v2183_v18 = vrot.slane %v2182_v7, 2 }
 0x18f   :  { %v2171_v40 = vadd.f32 %v2170_v44, %v2169_v59  ;;  %v2184_v50 = vadd.f32 %v2183_v18, %v2182_v7 }
 0x191   :  { %v2172_v57 = vrot.slane %v2171_v40, 1  ;;  %v2185_v6 = vrot.slane %v2184_v50, 1 }
 0x193   :  { %v2173_v16 = vadd.f32 %v2172_v57, %v2171_v40  ;;  %v2186_v49 = vadd.f32 %v2185_v6, %v2184_v50 }
 0x195   :  { %v2188_v53 = vsel %vm2187_vm7, %v2173_v16, %v2186_v49 }
 0x196   :  { %2189 = vst [vmem:[%s4134_s5] sm:$0x3] %v2188_v53 }
 0x197   :  { %2194 = vsyncpa [#allocation3], 1 }

</bundles_post_ra>
